<compile_context>
chip_gen: v5e
topology: v5e:2x2
jax: 0.10.0
libtpu: 0.0.40
codegen_flags: <defaults>
</compile_context>

<pallas_src>
import jax
import jax.numpy as jnp
from jax.experimental import pallas as pl
from jax.experimental.pallas import tpu as pltpu


HP = 128   # hidden dim (3) padded to one full lane width
CP = 128   # num_classes (4) padded to one full lane width


def _round_up(n, m):
    return (n + m - 1) // m * m


def _pick_tile(n_pad, target):
    """Largest multiple of 128 <= target that divides n_pad (n_pad is a mult. of 128)."""
    t = min(target, n_pad)
    while n_pad % t:
        t -= 128
    return t


def _vmem_capacity_bytes():
    """Physical VMEM of the attached TPU; conservative fallback = v7x per-TC 64 MiB."""
    try:
        return int(pltpu.get_tpu_info().vmem_capacity_bytes)
    except Exception:
        return 64 << 20


def _agg_live_vmem_bytes(tm, tk, n_pad, xw_resident):
    a_bytes = 2 * tm * tk * 2                                 # A_hat bf16, double-buffered
    xw_bytes = 2 * (n_pad if xw_resident else tk) * HP * 2    # XW bf16
    acc_bytes = tm * HP * 4                                   # f32 accumulator scratch
    out_bytes = 2 * tm * HP * 4 + 2 * tm * CP * 4             # h / z outputs, double-buffered
    param_bytes = 2 * (HP * 4 + HP * CP * 2 + CP * 4)         # b1, W2(bf16), b2
    return a_bytes + xw_bytes + acc_bytes + out_bytes + param_bytes


def _choose_agg_tiles(n_pad, xw_resident, budget):
    for target in (2048, 1024, 512, 256, 128):
        tm = tk = _pick_tile(n_pad, target)
        if _agg_live_vmem_bytes(tm, tk, n_pad, xw_resident) <= budget:
            return tm, tk
    return 128, 128


# ------------------------------ Pallas kernels -------------------------------
def xw_kernel(x_ref, w1_ref, xw_ref, acc_ref):
    # XW = X @ W_gcn, row-tiled with an f-reduction axis; lane-dense bf16 output.
    c = pl.program_id(1)

    @pl.when(c == 0)
    def _():
        acc_ref[...] = jnp.zeros_like(acc_ref)

    acc_ref[...] += jnp.dot(x_ref[...], w1_ref[...],
                            preferred_element_type=jnp.float32)

    @pl.when(c == pl.num_programs(1) - 1)
    def _():
        xw_ref[...] = acc_ref[...].astype(xw_ref.dtype)


def make_agg_kernel(xw_resident, tk):
    # h = relu(A_hat @ XW + b1) ; z = h @ W2 + b2   (accumulate over the k axis)
    def gcn_agg_kernel(a_ref, xw_ref, b1_ref, w2_ref, b2_ref, h_ref, z_ref, acc_ref):
        k = pl.program_id(1)

        @pl.when(k == 0)
        def _():
            acc_ref[...] = jnp.zeros_like(acc_ref)

        if xw_resident:
            # XW lives whole in VMEM (constant index_map => DMA'd exactly once);
            # slice the k-th slab out of it.
            start = pl.multiple_of(k * tk, 128)
            xw_blk = xw_ref[pl.ds(start, tk), :]
        else:
            xw_blk = xw_ref[...]

        acc_ref[...] += jnp.dot(a_ref[...], xw_blk,
                                preferred_element_type=jnp.float32)

        @pl.when(k == pl.num_programs(1) - 1)
        def _():
            h = jnp.maximum(acc_ref[...] + b1_ref[...], 0.0)
            h_ref[...] = h.astype(h_ref.dtype)
            # bf16 Linear head: single-pass MXU, f32 accumulation.
            z = jnp.dot(h.astype(jnp.bfloat16), w2_ref[...],
                        preferred_element_type=jnp.float32) + b2_ref[...]
            z_ref[...] = z.astype(z_ref.dtype)

    return gcn_agg_kernel


# --------------------------------- wrapper ------------------------------------
def gcn_forward(a_hat, x, w_gcn, b_gcn, w_out_t, b_out):
    n, f = x.shape
    hidden = w_gcn.shape[1]
    num_classes = w_out_t.shape[1]

    n_pad = _round_up(n, 128)
    f_pad = _round_up(f, 128)

    # Per-generation VMEM budget (never rely on the scoped default alone).
    vmem_cap = _vmem_capacity_bytes()
    budget = min(vmem_cap // 2, 48 << 20)

    # Keep XW fully VMEM-resident when it is small relative to the budget;
    # otherwise stream (tk, HP) slabs per k step.
    xw_resident = (2 * n_pad * HP * 2) <= (budget // 4)
    tm, tk = _choose_agg_tiles(n_pad, xw_resident, budget)

    # Host-side zero-padding to lane-dense shapes; bf16 for the streamed operands.
    # TODO(synk): on v5e/v6e (A+I) could be stored int8 with D^{-1/2} folded into XW
    # and a per-row output scale; on v7x fp8 e4m3. Kept bf16 here for accuracy parity.
    a_p = jnp.zeros((n_pad, n_pad), jnp.bfloat16).at[:n, :n].set(a_hat.astype(jnp.bfloat16))
    x_p = jnp.zeros((n_pad, f_pad), jnp.bfloat16).at[:n, :f].set(x.astype(jnp.bfloat16))
    w1_p = jnp.zeros((f_pad, HP), jnp.bfloat16).at[:f, :hidden].set(w_gcn.astype(jnp.bfloat16))
    b1_p = jnp.zeros((1, HP), jnp.float32).at[:, :hidden].set(b_gcn.reshape(1, hidden))
    w2_p = jnp.zeros((HP, CP), jnp.bfloat16).at[:hidden, :num_classes].set(
        w_out_t.astype(jnp.bfloat16))
    b2_p = jnp.zeros((1, CP), jnp.float32).at[:, :num_classes].set(b_out.reshape(1, num_classes))

    # ---- kernel 1: XW = X @ W_gcn (computed once; small row tile + f reduction) ----
    tm1 = _pick_tile(n_pad, 512)
    tf = _pick_tile(f_pad, 512)
    xw = pl.pallas_call(
        xw_kernel,
        out_shape=jax.ShapeDtypeStruct((n_pad, HP), jnp.bfloat16),
        grid_spec=pltpu.PrefetchScalarGridSpec(
            num_scalar_prefetch=0,
            grid=(n_pad // tm1, f_pad // tf),
            in_specs=[pl.BlockSpec((tm1, tf), lambda r, c: (r, c)),
                      pl.BlockSpec((tf, HP), lambda r, c: (c, 0))],
            out_specs=pl.BlockSpec((tm1, HP), lambda r, c: (r, 0)),
            scratch_shapes=[pltpu.VMEM((tm1, HP), jnp.float32)],
        ),
        compiler_params=pltpu.CompilerParams(
            dimension_semantics=("parallel", "arbitrary")),
    )(x_p, w1_p)

    # ---- kernel 2: tiled A_hat @ XW + bias/ReLU + Linear head ----
    if xw_resident:
        xw_spec = pl.BlockSpec((n_pad, HP), lambda i, k: (0, 0))   # DMA'd once, resident
    else:
        xw_spec = pl.BlockSpec((tk, HP), lambda i, k: (k, 0))      # streamed per k step

    h_p, z_p = pl.pallas_call(
        make_agg_kernel(xw_resident, tk),
        out_shape=(jax.ShapeDtypeStruct((n_pad, HP), jnp.float32),
                   jax.ShapeDtypeStruct((n_pad, CP), jnp.float32)),
        grid_spec=pltpu.PrefetchScalarGridSpec(
            num_scalar_prefetch=0,
            grid=(n_pad // tm, n_pad // tk),          # (row tiles, k reduction last)
            in_specs=[pl.BlockSpec((tm, tk), lambda i, k: (i, k)),   # A_hat tile
                      xw_spec,                                        # XW
                      pl.BlockSpec((1, HP), lambda i, k: (0, 0)),     # b_gcn
                      pl.BlockSpec((HP, CP), lambda i, k: (0, 0)),    # W_out.T (bf16)
                      pl.BlockSpec((1, CP), lambda i, k: (0, 0))],    # b_out
            out_specs=(pl.BlockSpec((tm, HP), lambda i, k: (i, 0)),
                       pl.BlockSpec((tm, CP), lambda i, k: (i, 0))),
            scratch_shapes=[pltpu.VMEM((tm, HP), jnp.float32)],
        ),
        compiler_params=pltpu.CompilerParams(
            dimension_semantics=("parallel", "arbitrary"),
            vmem_limit_bytes=budget),
    )(a_p, xw, b1_p, w2_p, b2_p)

    return h_p[:n, :hidden], z_p[:n, :num_classes]


# ------------------------------- glue (JAX) ----------------------------------
def normalized_adjacency(edge_index, num_nodes):
    """Dense D^{-1/2} (A + I) D^{-1/2}, matching PyG GCNConv (add_self_loops=True).
    Note: assumes edge_index has no explicit self-loops / duplicate edges."""
    # TODO(synk): for real (large, sparse) graphs, skip the dense O(N^2) A_hat and
    # stream CSR offsets/indices via PrefetchScalarGridSpec + gather of XW rows.
    src = edge_index[0]
    dst = edge_index[1]
    adj = jnp.zeros((num_nodes, num_nodes), jnp.float32)
    adj = adj.at[dst, src].add(1.0)          # message j -> i lands in row i, col j
    adj = adj + jnp.eye(num_nodes, dtype=jnp.float32)
    deg = adj.sum(axis=1)
    d_inv_sqrt = jnp.where(deg > 0, 1.0 / jnp.sqrt(deg), 0.0)
    return d_inv_sqrt[:, None] * adj * d_inv_sqrt[None, :]


if __name__ == "__main__":
    # Small synthetic "dataset": N nodes, F features, C classes, hidden = 3.
    N, F, HIDDEN, C = 8, 16, 3, 4

    key = jax.random.PRNGKey(0)
    kx, kw1, kw2, kb2 = jax.random.split(key, 4)

    # Node features.
    x = jax.random.normal(kx, (N, F), dtype=jnp.float32)

    # Deterministic small graph (undirected edges given in both directions), [2, E].
    edges = [(0, 1), (1, 2), (2, 3), (3, 4), (4, 5), (5, 6), (6, 7), (7, 0), (0, 4), (2, 6)]
    src = [s for s, d in edges] + [d for s, d in edges]
    dst = [d for s, d in edges] + [s for s, d in edges]
    edge_index = jnp.array([src, dst], dtype=jnp.int32)

    # Parameters (deterministic synthetic init mirroring module shapes).
    # GCNConv: weight [F, HIDDEN], bias zeros -> kept as [1, HIDDEN].
    w_gcn = jax.random.normal(kw1, (F, HIDDEN), dtype=jnp.float32) * (2.0 / (F + HIDDEN)) ** 0.5
    b_gcn = jnp.zeros((1, HIDDEN), dtype=jnp.float32)
    # Linear(3, C): torch weight is [C, 3]; pass transposed [3, C] to the kernel.
    w_out_t = jax.random.normal(kw2, (HIDDEN, C), dtype=jnp.float32) * (1.0 / HIDDEN) ** 0.5
    b_out = jax.random.normal(kb2, (1, C), dtype=jnp.float32) * 0.1

    a_hat = normalized_adjacency(edge_index, N)

    h, z = gcn_forward(a_hat, x, w_gcn, b_gcn, w_out_t, b_out)
    jax.block_until_ready((h, z))

    # Pure-JAX reference mirroring the kernel's bf16 quantization of streamed operands.
    a_bf = a_hat.astype(jnp.bfloat16).astype(jnp.float32)
    x_bf = x.astype(jnp.bfloat16).astype(jnp.float32)
    w1_bf = w_gcn.astype(jnp.bfloat16).astype(jnp.float32)
    xw_ref = (x_bf @ w1_bf).astype(jnp.bfloat16).astype(jnp.float32)
    h_ref = jnp.maximum(a_bf @ xw_ref + b_gcn, 0.0)
    h_bf = h_ref.astype(jnp.bfloat16).astype(jnp.float32)
    w2_bf = w_out_t.astype(jnp.bfloat16).astype(jnp.float32)
    z_ref = h_bf @ w2_bf + b_out

    assert h.shape == (N, HIDDEN) and z.shape == (N, C)
    assert jnp.allclose(h, h_ref, atol=2e-2, rtol=2e-2), "h mismatch"
    assert jnp.allclose(z, z_ref, atol=2e-2, rtol=2e-2), "z mismatch"

    print("KERNEL_OK")
</pallas_src>

<mosaic_0001>
module attributes {stable_mosaic.version = 11 : i64} {
  func.func @xw_kernel(%arg0: i32, %arg1: i32, %arg2: memref<128x128xbf16, #tpu.memory_space<vmem>>, %arg3: memref<128x128xbf16, #tpu.memory_space<vmem>>, %arg4: memref<128x128xbf16, #tpu.memory_space<vmem>>, %arg5: memref<128x128xf32, #tpu.memory_space<vmem>>) attributes {dimension_semantics = [#tpu.dimension_semantics<parallel>, #tpu.dimension_semantics<arbitrary>], iteration_bounds = array<i64: 1, 1>, scalar_prefetch = 0 : i64, scratch_operands = 1 : i64, tpu.core_type = #tpu.core_type<tc>, window_params = [{transform_indices = @transform_0, window_bounds = array<i64: 128, 128>}, {transform_indices = @transform_1, window_bounds = array<i64: 128, 128>}, {transform_indices = @transform_2, window_bounds = array<i64: 128, 128>}]} {
    %c0_i32 = arith.constant 0 : i32
    %0 = arith.cmpi eq, %arg1, %c0_i32 : i32
    %1 = arith.extui %0 : i1 to i32
    %c0_i32_0 = arith.constant 0 : i32
    %2 = arith.cmpi ne, %1, %c0_i32_0 : i32
    scf.if %2 {
      %cst_10 = arith.constant 0.000000e+00 : f32
      %12 = vector.broadcast %cst_10 : f32 to vector<128x128xf32>
      %c0_11 = arith.constant 0 : index
      %c0_12 = arith.constant 0 : index
      %13 = vector.load %arg5[%c0_11, %c0_12] : memref<128x128xf32, #tpu.memory_space<vmem>>, vector<128x128xf32>
      tpu.vector_store %arg5[%c0_11, %c0_12], %12 {strides = array<i32>} : memref<128x128xf32, #tpu.memory_space<vmem>>, vector<128x128xf32>,
    } else {
    }
    %c0 = arith.constant 0 : index
    %c0_1 = arith.constant 0 : index
    %3 = vector.load %arg5[%c0, %c0_1] : memref<128x128xf32, #tpu.memory_space<vmem>>, vector<128x128xf32>
    %c0_2 = arith.constant 0 : index
    %c0_3 = arith.constant 0 : index
    %4 = vector.load %arg2[%c0_2, %c0_3] : memref<128x128xbf16, #tpu.memory_space<vmem>>, vector<128x128xbf16>
    %c0_4 = arith.constant 0 : index
    %c0_5 = arith.constant 0 : index
    %5 = vector.load %arg3[%c0_4, %c0_5] : memref<128x128xbf16, #tpu.memory_space<vmem>>, vector<128x128xbf16>
    %cst = arith.constant dense<0.000000e+00> : vector<128x128xf32>
    %6 = tpu.matmul %4, %5, %cst {dimension_numbers = #tpu.dot_dimension_numbers<[1], [0], [0], [1], [0, 0, 1, 1], [], []>} : vector<128x128xbf16>, vector<128x128xbf16>, vector<128x128xf32> -> vector<128x128xf32>
    %7 = arith.addf %3, %6 : vector<128x128xf32>
    %c0_6 = arith.constant 0 : index
    %c0_7 = arith.constant 0 : index
    %8 = vector.load %arg5[%c0_6, %c0_7] : memref<128x128xf32, #tpu.memory_space<vmem>>, vector<128x128xf32>
    tpu.vector_store %arg5[%c0_6, %c0_7], %7 {strides = array<i32>} : memref<128x128xf32, #tpu.memory_space<vmem>>, vector<128x128xf32>,
    %c0_i32_8 = arith.constant 0 : i32
    %9 = arith.cmpi eq, %arg1, %c0_i32_8 : i32
    %10 = arith.extui %9 : i1 to i32
    %c0_i32_9 = arith.constant 0 : i32
    %11 = arith.cmpi ne, %10, %c0_i32_9 : i32
    scf.if %11 {
      %c0_10 = arith.constant 0 : index
      %c0_11 = arith.constant 0 : index
      %12 = vector.load %arg5[%c0_10, %c0_11] : memref<128x128xf32, #tpu.memory_space<vmem>>, vector<128x128xf32>
      %13 = arith.truncf %12 : vector<128x128xf32> to vector<128x128xbf16>
      %c0_12 = arith.constant 0 : index
      %c0_13 = arith.constant 0 : index
      %14 = vector.load %arg4[%c0_12, %c0_13] : memref<128x128xbf16, #tpu.memory_space<vmem>>, vector<128x128xbf16>
      tpu.vector_store %arg4[%c0_12, %c0_13], %13 {strides = array<i32>} : memref<128x128xbf16, #tpu.memory_space<vmem>>, vector<128x128xbf16>,
    } else {
    }
    return
  }
  func.func @transform_0(%arg0: i32, %arg1: i32) -> (i32, i32) {
    %c0_i32 = arith.constant 0 : i32
    return %arg0, %arg1 : i32, i32
  }
  func.func @transform_1(%arg0: i32, %arg1: i32) -> (i32, i32) {
    %c0_i32 = arith.constant 0 : i32
    %c0_i32_0 = arith.constant 0 : i32
    return %arg1, %c0_i32 : i32, i32
  }
  func.func @transform_2(%arg0: i32, %arg1: i32) -> (i32, i32) {
    %c0_i32 = arith.constant 0 : i32
    %c0_i32_0 = arith.constant 0 : i32
    return %arg0, %c0_i32 : i32, i32
  }
}

</mosaic_0001>

<bundles_post_ra>
// kernel: tpu_custom_call.1
= control target key start
LH: loop header
LB: loop body
LE: loop exit
PB: predicated region body
PF: predicated region fallthrough
CT: control target
= control target key end

     0   :  { %7 = vsyncpa [#allocation4], 0  ;;  %s632_s0 = inlined_call_operand.hbm [shape: bf16[128,128], index: 0, kind: input, shape index: {}]   ;;  %s633_s1 = inlined_call_operand.hbm [shape: bf16[128,128], index: 1, kind: input, shape index: {}]   ;;  %s634_s2 = inlined_call_operand.hbm [shape: bf16[128,128], index: 2, kind: output, shape index: {}]  }
   0x1   :  { %8 = vsyncpa [#allocation7], 0 }
   0x2   :  { %9 = vsyncpa [#allocation5], 0  ;;  %s14_s11 = sshll.u32 %s632_s0, 4  ;;  %s594_s12 = smov [#allocation3]   ;;  %s15_s11 = int_to_ptr.hbm [resolvable:$true] %s14_s11 }
   0x3   :  { %s16_s13 = sshll.u32 %s594_s12, 4  ;;  %s27_s16 = sshll.u32 %s633_s1, 4  ;;  %s17_s13 = int_to_ptr.vmem [resolvable:$true] %s16_s13  ;;  %s28_s16 = int_to_ptr.hbm [resolvable:$true] %s27_s16 }
   0x4   :  { %s595_s17 = smov 64   ;;  %s596_s18 = smov 4  }
   0x5   :  { %22 = dma.hbm_to_vmem [thread:$0]  %s15_s11, 1024, %s17_s13, [#allocation4], %s595_s17, %s595_s17, %s596_s18  }
   0x6   :  { %s597_s19 = smov [#allocation6]  }
   0x7   :  { %s29_s20 = sshll.u32 %s597_s19, 4  ;;  %s30_s20 = int_to_ptr.vmem [resolvable:$true] %s29_s20 }
   0x8   :  { %35 = dma.hbm_to_vmem [thread:$0]  %s28_s16, 1024, %s30_s20, [#allocation7], %s595_s17, %s595_s17, %s596_s18  }
   0x9   :  { %588 = dma.done.wait [#allocation4], 1024  }
   0xa   :  { %589 = vsyncadd [#allocation4], 4294966272 }
   0xb   :  { %590 = dma.done.wait [#allocation7], 1024  }
   0xc   :  { %591 = vsyncadd [#allocation7], 4294966272  ;;  %v439_v0 = vld [vmem:[#allocation6 + $0x38] sm:$0xff]  ;;  %v438_v1 = vld [vmem:[#allocation6 + $0x30] sm:$0xff]  ;;  %s598_s0 = smov [#allocation8]   ;;  %s346_s23 = sshll.u32 %s634_s2, 4  ;;  %s347_s23 = int_to_ptr.hbm [resolvable:$true] %s346_s23 }
   0xd   :  { %208 = vmatpush.bf16.msra.mxu0 %v439_v0  ;;  %487 = vmatpush.bf16.msra.mxu1 %v439_v0  ;;  %v437_v2 = vld [vmem:[#allocation6 + $0x28] sm:$0xff]  ;;  %v436_v3 = vld [vmem:[#allocation6 + $0x20] sm:$0xff]  ;;  %v435_v4 = vld [vmem:[#allocation6 + $0x18] sm:$0xff]  ;;  %s344_s1 = sshll.u32 %s598_s0, 4  ;;  %s345_s1 = int_to_ptr.vmem [resolvable:$true] %s344_s1 }
   0xe   :  { %488 = vmatpush.bf16.msra.mxu2 %v439_v0  ;;  %489 = vmatpush.bf16.msra.mxu3 %v439_v0  ;;  %v434_v5 = vld [vmem:[#allocation6 + $0x10] sm:$0xff]  ;;  %v433_v6 = vld [vmem:[#allocation6 + $0x8] sm:$0xff]  ;;  %v432_v7 = vld [vmem:[#allocation6] sm:$0xff] }
   0xf   :  { %v424_v8 = vld [vmem:[#allocation3] sm:$0xff]  ;;  %v426_v9 = vld [vmem:[#allocation3 + $0x10] sm:$0xff]  ;;  %v425_v12 = vld [vmem:[#allocation3 + $0x8] sm:$0xff] }
  0x10   :  { %v428_v10 = vld [vmem:[#allocation3 + $0x20] sm:$0xff]  ;;  %v430_v11 = vld [vmem:[#allocation3 + $0x30] sm:$0xff]  ;;  %v427_v13 = vld [vmem:[#allocation3 + $0x18] sm:$0xff] }
  0x11   :  { %209 = vmatpush.bf16.msra.mxu0 %v438_v1  ;;  %490 = vmatpush.bf16.msra.mxu1 %v438_v1  ;;  %v429_v14 = vld [vmem:[#allocation3 + $0x28] sm:$0xff]  ;;  %v431_v15 = vld [vmem:[#allocation3 + $0x38] sm:$0xff] }
  0x12   :  { %491 = vmatpush.bf16.msra.mxu2 %v438_v1  ;;  %492 = vmatpush.bf16.msra.mxu3 %v438_v1 }
  0x15   :  { %210 = vmatpush.bf16.msra.mxu0 %v437_v2  ;;  %493 = vmatpush.bf16.msra.mxu1 %v437_v2 }
  0x16   :  { %494 = vmatpush.bf16.msra.mxu2 %v437_v2  ;;  %495 = vmatpush.bf16.msra.mxu3 %v437_v2 }
  0x19   :  { %211 = vmatpush.bf16.msra.mxu0 %v436_v3  ;;  %496 = vmatpush.bf16.msra.mxu1 %v436_v3 }
  0x1a   :  { %497 = vmatpush.bf16.msra.mxu2 %v436_v3  ;;  %498 = vmatpush.bf16.msra.mxu3 %v436_v3 }
  0x1d   :  { %212 = vmatpush.bf16.msra.mxu0 %v435_v4  ;;  %499 = vmatpush.bf16.msra.mxu1 %v435_v4 }
  0x1e   :  { %500 = vmatpush.bf16.msra.mxu2 %v435_v4  ;;  %501 = vmatpush.bf16.msra.mxu3 %v435_v4 }
  0x21   :  { %213 = vmatpush.bf16.msra.mxu0 %v434_v5  ;;  %502 = vmatpush.bf16.msra.mxu1 %v434_v5 }
  0x22   :  { %503 = vmatpush.bf16.msra.mxu2 %v434_v5  ;;  %504 = vmatpush.bf16.msra.mxu3 %v434_v5 }
  0x25   :  { %214 = vmatpush.bf16.msra.mxu0 %v433_v6  ;;  %505 = vmatpush.bf16.msra.mxu1 %v433_v6 }
  0x26   :  { %506 = vmatpush.bf16.msra.mxu2 %v433_v6  ;;  %507 = vmatpush.bf16.msra.mxu3 %v433_v6 }
  0x29   :  { %215 = vmatpush.bf16.msra.mxu0 %v432_v7  ;;  %508 = vmatpush.bf16.msra.mxu1 %v432_v7 }
  0x2a   :  { %509 = vmatpush.bf16.msra.mxu2 %v432_v7  ;;  %510 = vmatpush.bf16.msra.mxu3 %v432_v7 }
  0x2c   :  { %216 = vmatmul.bf16.vlgmr.msra.gmra.mxu0 %v424_v8  ;;  %226 = vmatmul.bf16.vlgmr.msra.gmra.mxu1 %v426_v9 }
  0x2d   :  { %236 = vmatmul.bf16.vlgmr.msra.gmra.mxu2 %v428_v10  ;;  %246 = vmatmul.bf16.vlgmr.msra.gmra.mxu3 %v430_v11 }
  0x3c   :  { %221 = vmatmul.bf16.gmra.mxu0 %v425_v12  ;;  %231 = vmatmul.bf16.gmra.mxu1 %v427_v13 }
  0x3d   :  { %241 = vmatmul.bf16.gmra.mxu2 %v429_v14  ;;  %251 = vmatmul.bf16.gmra.mxu3 %v431_v15 }
  0xa9   :  { %v217_v16 = vpop.f32.mrf.mxu0  ;;  %v227_v17 = vpop.f32.mrf.mxu1 }
  0xb0   :  { %v237_v18 = vpop.f32.mrf.mxu2  ;;  %v247_v19 = vpop.f32.mrf.mxu3 }
  0xb1   :  { %v219_v20 = vpop.f32.mrf.mxu0  ;;  %v229_v21 = vpop.f32.mrf.mxu1 }
  0xb2   :  { %v443_v22 = vpack.c.bf16 %v219_v20, %v217_v16  ;;  %v453_v23 = vpack.c.bf16 %v229_v21, %v227_v17 }
  0xb4   :  { %444 = vst [vmem:[#allocation8] sm:$0xff] %v443_v22  }
  0xb5   :  { %481 = vst [vmem:[#allocation8 + $0x10] sm:$0xff] %v453_v23  }
  0xb8   :  { %v239_v24 = vpop.f32.mrf.mxu2  ;;  %v249_v25 = vpop.f32.mrf.mxu3 }
  0xb9   :  { %v463_v26 = vpack.c.bf16 %v239_v24, %v237_v18  ;;  %v473_v27 = vpack.c.bf16 %v249_v25, %v247_v19  ;;  %v222_v28 = vpop.f32.mrf.mxu0  ;;  %v232_v29 = vpop.f32.mrf.mxu1 }
  0xbb   :  { %483 = vst [vmem:[#allocation8 + $0x20] sm:$0xff] %v463_v26  }
  0xbc   :  { %485 = vst [vmem:[#allocation8 + $0x30] sm:$0xff] %v473_v27  }
  0xc0   :  { %v242_v30 = vpop.f32.mrf.mxu2  ;;  %v252_v31 = vpop.f32.mrf.mxu3 }
  0xc1   :  { %v224_v32 = vpop.f32.mrf.mxu0  ;;  %v234_v33 = vpop.f32.mrf.mxu1 }
  0xc2   :  { %v448_v34 = vpack.c.bf16 %v224_v32, %v222_v28  ;;  %v458_v35 = vpack.c.bf16 %v234_v33, %v232_v29 }
  0xc4   :  { %480 = vst [vmem:[#allocation8 + $0x8] sm:$0xff] %v448_v34  }
  0xc5   :  { %482 = vst [vmem:[#allocation8 + $0x18] sm:$0xff] %v458_v35  }
  0xc8   :  { %v244_v36 = vpop.f32.mrf.mxu2  ;;  %v254_v37 = vpop.f32.mrf.mxu3 }
  0xc9   :  { %v468_v38 = vpack.c.bf16 %v244_v36, %v242_v30  ;;  %v478_v39 = vpack.c.bf16 %v254_v37, %v252_v31 }
  0xcb   :  { %484 = vst [vmem:[#allocation8 + $0x28] sm:$0xff] %v468_v38  }
  0xcc   :  { %486 = vst [vmem:[#allocation8 + $0x38] sm:$0xff] %v478_v39  }
  0xcd   :  { %352 = dma.vmem_to_hbm [thread:$0]  %s345_s1, 1024, %s347_s23, [#allocation5], %s595_s17, %s595_s17, %s596_s18  }
  0xce   :  { %592 = dma.done.wait [#allocation5], 1024  }
  0xcf   :  { %593 = vsyncadd [#allocation5], 4294966272 }
  0xd0   :  { %357 = vsyncpa [#allocation4], 1 }
  0xd1   :  { %358 = vsyncpa [#allocation7], 1 }
  0xd2   :  { %359 = vsyncpa [#allocation5], 1 }

</bundles_post_ra>
